<compile_context>
chip_gen: v6e
topology: v6e:2x2x1
jax: 0.10.0
libtpu: 0.0.40
codegen_flags: <defaults>
</compile_context>

<pallas_src>
import functools

import jax
import jax.numpy as jnp
from jax.experimental import pallas as pl
from jax.experimental.pallas import tpu as pltpu

LANE = 128


# --------------------------------------------------------------------------
# in-kernel helpers
# --------------------------------------------------------------------------
def _conv_tile(x_ref, w_ref, *, th, w_out, kh):
    """Bias-free conv over one (th x w_out) tile as KH accumulating matmuls.

    x_ref : (1, th+kh-1, w_out, kw*cin)  row-halo tile, KW taps pre-concatenated
    w_ref : (kh, kw*cin, cc_pad)         per-row-tap weight matrices
    returns (th*w_out, cc_pad) float32
    """
    rows = th * w_out
    acc = None
    for i in range(kh):                                    # static python loop
        piece = x_ref[0, i:i + th].reshape(rows, -1)       # (rows, kw*cin)
        part = jnp.dot(piece, w_ref[i], preferred_element_type=jnp.float32)
        acc = part if acc is None else acc + part
    return acc


def _stats_kernel(x_ref, w_ref, stats_ref, *, th, w_out, kh):
    """Phase 1: conv tile -> per-conv-channel [sum; sum of squares]."""
    acc = _conv_tile(x_ref, w_ref, th=th, w_out=w_out, kh=kh)
    s1 = jnp.sum(acc, axis=0, keepdims=True)               # (1, cc_pad)
    s2 = jnp.sum(acc * acc, axis=0, keepdims=True)         # (1, cc_pad)
    stats_ref[0] = jnp.concatenate([s1, s2], axis=0)       # (2, cc_pad)


def _conv_affine_relu_kernel(x_ref, w_ref, scale_ref, shift_ref, o_ref, *,
                             th, w_out, kh, cc):
    """Phase 2: conv tile, fused BN affine (bias folded in) + ReLU, packed store."""
    acc = _conv_tile(x_ref, w_ref, th=th, w_out=w_out, kh=kh)
    y = jnp.maximum(acc * scale_ref[...] + shift_ref[...], 0.0)   # (rows, cc_pad)
    yt = jnp.transpose(y, (1, 0))                                  # (cc_pad, rows)
    o_ref[0] = yt[:cc, :].astype(o_ref.dtype)                      # only real channels


# --------------------------------------------------------------------------
# wrapper
# --------------------------------------------------------------------------
def _pick_row_tile(h_out, w_out, k_in, cc, cc_pad, kh, in_bytes, store_bytes,
                   budget_bytes):
    """Largest h-tile (divisor of h_out) fitting the per-tile VMEM budget."""
    best = None
    for th in range(1, h_out + 1):
        if h_out % th:
            continue
        rows = th * w_out
        in_tile = (th + kh - 1) * w_out * k_in * in_bytes
        out_tile = cc * rows * store_bytes
        # compute scratch is NOT double-buffered: f32 acc + affine result +
        # transposed copy + the per-tap patch view.
        scratch = 3 * rows * cc_pad * 4 + rows * k_in * in_bytes
        fixed = kh * k_in * cc_pad * in_bytes + 4 * cc_pad * 4
        need = 2 * (in_tile + out_tile) + scratch + fixed
        if need <= budget_bytes:
            best = th
    return best


def ps_block(x_nchw, conv_w, conv_b, gamma, beta, *, scale_factor,
             kernel_size=3, stride=1, padding=1, eps=1e-5,
             matmul_dtype=jnp.bfloat16, store_dtype=jnp.bfloat16):
    """PSBlock forward. x_nchw: (N, Cin, H, W). Returns (N, Cout, H*r, W*r)."""
    assert stride == 1, "only stride=1 (the PSBlock default) is implemented"
    N, Cin, H, W = x_nchw.shape
    r = scale_factor
    Cout = gamma.shape[0]
    Cc = Cout * r * r
    KH = KW = kernel_size
    assert conv_w.shape == (Cc, Cin, KH, KW)

    H_out = H + 2 * padding - KH + 1
    W_out = W + 2 * padding - KW + 1
    Cc_pad = max(LANE, ((Cc + LANE - 1) // LANE) * LANE)
    K_in = KW * Cin
    out_dtype = x_nchw.dtype

    in_bytes = jnp.dtype(matmul_dtype).itemsize
    st_bytes = jnp.dtype(store_dtype).itemsize

    # Generation-aware VMEM budget (v7x has only 64 MiB physical per core).
    try:
        phys_vmem = int(pltpu.get_tpu_info().vmem_capacity_bytes)
    except Exception:
        phys_vmem = 64 * 1024 * 1024            # conservative (v7x-sized) default
    vmem_limit = min(40 * 1024 * 1024, int(phys_vmem * 0.6))
    budget = int(vmem_limit * 0.75)             # headroom for compiler scratch

    th = _pick_row_tile(H_out, W_out, K_in, Cc, Cc_pad, KH, in_bytes, st_bytes,
                        budget)
    if th is None:
        # TODO(synk): add W-axis tiling for very wide images; currently only H
        # is tiled, so refuse loudly instead of overflowing VMEM.
        raise ValueError("PSBlock tile does not fit VMEM even at th=1; "
                         "W-axis tiling not implemented")
    num_hb = H_out // th
    rows = th * W_out
    T = N * num_hb

    # ---- layout glue: NCHW -> NHWC, pad, KW-tap concat, row-gathered halo tiles
    x = jnp.transpose(x_nchw, (0, 2, 3, 1))                         # (N, H, W, Cin)
    xp = jnp.pad(x, ((0, 0), (padding, padding), (padding, padding), (0, 0)))
    xw = jnp.concatenate([xp[:, :, j:j + W_out, :] for j in range(KW)],
                         axis=-1).astype(matmul_dtype)              # (N, Hp, W_out, KW*Cin)
    row_idx = (jnp.arange(num_hb)[:, None] * th
               + jnp.arange(th + KH - 1)[None, :])                  # (num_hb, th+KH-1)
    tiles = xw[:, row_idx]                                          # single gather
    tiles = tiles.reshape(T, th + KH - 1, W_out, K_in)
    # TODO(synk): the halo tiles are still materialized in HBM by the wrapper;
    # a manual-DMA (memory_space=pl.ANY) halo fetch would remove this pass.

    # ---- weights: (KH, KW*Cin, Cc_pad), column order (j, ci) matches the tiles
    w2 = jnp.transpose(conv_w, (2, 3, 1, 0)).reshape(KH, K_in, Cc)
    w2 = jnp.pad(w2, ((0, 0), (0, 0), (0, Cc_pad - Cc))).astype(matmul_dtype)

    x_spec = pl.BlockSpec((1, th + KH - 1, W_out, K_in), lambda t: (t, 0, 0, 0))
    w_spec = pl.BlockSpec((KH, K_in, Cc_pad), lambda t: (0, 0, 0))
    vec_spec = pl.BlockSpec((1, Cc_pad), lambda t: (0, 0))
    stats_spec = pl.BlockSpec((1, 2, Cc_pad), lambda t: (t, 0, 0))
    out_spec = pl.BlockSpec((1, Cc, rows), lambda t: (t, 0, 0))

    cparams = pltpu.CompilerParams(
        dimension_semantics=("parallel",),      # flat grid -> balanced megacore
        vmem_limit_bytes=vmem_limit)
    common = dict(th=th, w_out=W_out, kh=KH)
    conv_flops = 2 * T * rows * KH * K_in * Cc_pad
    in_bytes_total = tiles.size * in_bytes + w2.size * in_bytes

    # ---- phase 1: conv + per-tile batch-stat partial sums (tiny output) ----
    stats = pl.pallas_call(
        functools.partial(_stats_kernel, **common),
        out_shape=jax.ShapeDtypeStruct((T, 2, Cc_pad), jnp.float32),
        grid=(T,),
        in_specs=[x_spec, w_spec],
        out_specs=stats_spec,
        compiler_params=cparams,
        cost_estimate=pl.CostEstimate(
            flops=int(conv_flops), transcendentals=0,
            bytes_accessed=int(in_bytes_total + T * 2 * Cc_pad * 4)),
    )(tiles, w2)

    # ---- BN finalization, hoisted out of the kernels (tiny, plain XLA) ----
    tot = jnp.sum(stats, axis=0)                       # (2, Cc_pad)
    inv_m = 1.0 / float(N * H_out * W_out)
    b = conv_b.astype(jnp.float32)
    m_nb = tot[0, :Cc] * inv_m                         # mean of bias-free conv
    q_nb = tot[1, :Cc] * inv_m                         # E[(bias-free conv)^2]
    mean_c = m_nb + b
    ex2_c = q_nb + 2.0 * b * m_nb + b * b
    mean_g = jnp.mean(mean_c.reshape(Cout, r * r), axis=1)
    ex2_g = jnp.mean(ex2_c.reshape(Cout, r * r), axis=1)
    var_g = jnp.maximum(ex2_g - mean_g * mean_g, 0.0)  # clamp: no NaN from rsqrt
    scale_g = gamma.astype(jnp.float32) * jax.lax.rsqrt(var_g + eps)
    shift_g = beta.astype(jnp.float32) - mean_g * scale_g
    scale_c = jnp.repeat(scale_g, r * r)               # per conv channel
    shift_c = jnp.repeat(shift_g, r * r) + b * scale_c  # conv bias folded in
    pad_c = Cc_pad - Cc
    scale_row = jnp.pad(scale_c.reshape(1, Cc), ((0, 0), (0, pad_c)))
    shift_row = jnp.pad(shift_c.reshape(1, Cc), ((0, 0), (0, pad_c)))

    # ---- phase 2: recompute conv tile, fused affine + ReLU, packed store ----
    y = pl.pallas_call(
        functools.partial(_conv_affine_relu_kernel, cc=Cc, **common),
        out_shape=jax.ShapeDtypeStruct((T, Cc, rows), store_dtype),
        grid=(T,),
        in_specs=[x_spec, w_spec, vec_spec, vec_spec],
        out_specs=out_spec,
        compiler_params=cparams,
        cost_estimate=pl.CostEstimate(
            flops=int(conv_flops), transcendentals=0,
            bytes_accessed=int(in_bytes_total + T * Cc * rows * st_bytes)),
    )(tiles, w2, scale_row, shift_row)

    # ---- PixelShuffle (pure layout glue on the packed, unpadded result) ----
    y = y.reshape(N, num_hb, Cout, r, r, th, W_out)
    y = jnp.transpose(y, (0, 2, 1, 5, 3, 6, 4))
    y = y.reshape(N, Cout, H_out * r, W_out * r).astype(out_dtype)
    return y

    # TODO(synk): PyTorch training-mode BatchNorm also updates running_mean/var
    # buffers as a side effect; that bookkeeping does not affect the forward
    # output and is not reproduced here.
    # TODO(synk): only the module defaults (activation='relu', norm='batch',
    # stride=1) are implemented; other activation/norm branches are not.
    # TODO(synk): batch variance uses the one-pass E[x^2]-mean^2 formula (with
    # the conv bias as an implicit shift); Welford-style tile merging would be
    # more robust when |mean| >> std.


# --------------------------------------------------------------------------
# reference (pure JAX) for correctness checking
# --------------------------------------------------------------------------
def _ps_block_reference(x, w, b, gamma, beta, r, eps=1e-5):
    y = jax.lax.conv_general_dilated(x, w, (1, 1), ((1, 1), (1, 1)),
                                     dimension_numbers=("NCHW", "OIHW", "NCHW"))
    y = y + b[None, :, None, None]
    N, Cc, H, W = y.shape
    Cout = Cc // (r * r)
    y = y.reshape(N, Cout, r, r, H, W).transpose(0, 1, 4, 2, 5, 3)
    y = y.reshape(N, Cout, H * r, W * r)
    mean = jnp.mean(y, axis=(0, 2, 3), keepdims=True)
    var = jnp.var(y, axis=(0, 2, 3), keepdims=True)
    y = (y - mean) * jax.lax.rsqrt(var + eps)
    y = y * gamma[None, :, None, None] + beta[None, :, None, None]
    return jnp.maximum(y, 0.0)


if __name__ == "__main__":
    key = jax.random.PRNGKey(0)
    N, Cin, H, W = 2, 4, 16, 16
    Cout, r = 4, 2

    k1, k2, k3 = jax.random.split(key, 3)
    x = jax.random.normal(k1, (N, Cin, H, W), jnp.float32)
    conv_w = 0.1 * jax.random.normal(k2, (Cout * r * r, Cin, 3, 3), jnp.float32)
    conv_b = 0.1 * jax.random.normal(k3, (Cout * r * r,), jnp.float32)
    gamma = jnp.ones((Cout,), jnp.float32)   # BatchNorm2d default init
    beta = jnp.zeros((Cout,), jnp.float32)

    out = ps_block(x, conv_w, conv_b, gamma, beta, scale_factor=r)
    jax.block_until_ready(out)
    assert out.shape == (N, Cout, H * r, W * r), out.shape
    assert bool(jnp.all(out >= 0.0))  # ReLU output

    ref = _ps_block_reference(x, conv_w, conv_b, gamma, beta, r)
    max_err = float(jnp.max(jnp.abs(out.astype(jnp.float32) - ref)))
    # bf16 MXU + bf16 store path vs f32 reference: allow small drift
    assert max_err < 5e-2, max_err
    print("KERNEL_OK")
</pallas_src>

<mosaic_0001>
module attributes {stable_mosaic.version = 11 : i64} {
  func.func @_stats_kernel(%arg0: i32, %arg1: memref<1x18x16x12xbf16, #tpu.memory_space<vmem>>, %arg2: memref<3x12x128xbf16, #tpu.memory_space<vmem>>, %arg3: memref<1x2x128xf32, #tpu.memory_space<vmem>>) attributes {dimension_semantics = [#tpu.dimension_semantics<parallel>], iteration_bounds = array<i64: 2>, scalar_prefetch = 0 : i64, scratch_operands = 0 : i64, tpu.core_type = #tpu.core_type<tc>, window_params = [{transform_indices = @transform_0, window_bounds = array<i64: 1, 18, 16, 12>}, {pipeline_mode = #tpu.pipeline_mode<synchronous>, transform_indices = @transform_1, window_bounds = array<i64: 3, 12, 128>}, {transform_indices = @transform_2, window_bounds = array<i64: 1, 2, 128>}]} {
    %c0 = arith.constant 0 : index
    %c0_0 = arith.constant 0 : index
    %c0_1 = arith.constant 0 : index
    %c0_2 = arith.constant 0 : index
    %0 = vector.load %arg1[%c0, %c0_0, %c0_1, %c0_2] : memref<1x18x16x12xbf16, #tpu.memory_space<vmem>>, vector<1x16x16x12xbf16>
    %1 = vector.shape_cast %0 : vector<1x16x16x12xbf16> to vector<16x16x12xbf16>
    %2 = vector.shape_cast %1 : vector<16x16x12xbf16> to vector<256x12xbf16>
    %c0_3 = arith.constant 0 : index
    %c0_4 = arith.constant 0 : index
    %c0_5 = arith.constant 0 : index
    %3 = vector.load %arg2[%c0_3, %c0_4, %c0_5] : memref<3x12x128xbf16, #tpu.memory_space<vmem>>, vector<1x12x128xbf16>
    %4 = vector.shape_cast %3 : vector<1x12x128xbf16> to vector<12x128xbf16>
    %cst = arith.constant dense<0.000000e+00> : vector<256x128xf32>
    %5 = tpu.matmul %2, %4, %cst {dimension_numbers = #tpu.dot_dimension_numbers<[1], [0], [0], [1], [0, 0, 1, 1], [], []>} : vector<256x12xbf16>, vector<12x128xbf16>, vector<256x128xf32> -> vector<256x128xf32>
    %c0_6 = arith.constant 0 : index
    %c1 = arith.constant 1 : index
    %c0_7 = arith.constant 0 : index
    %c0_8 = arith.constant 0 : index
    %6 = vector.load %arg1[%c0_6, %c1, %c0_7, %c0_8] : memref<1x18x16x12xbf16, #tpu.memory_space<vmem>>, vector<1x16x16x12xbf16>
    %7 = vector.shape_cast %6 : vector<1x16x16x12xbf16> to vector<16x16x12xbf16>
    %8 = vector.shape_cast %7 : vector<16x16x12xbf16> to vector<256x12xbf16>
    %c1_9 = arith.constant 1 : index
    %c0_10 = arith.constant 0 : index
    %c0_11 = arith.constant 0 : index
    %9 = vector.load %arg2[%c1_9, %c0_10, %c0_11] : memref<3x12x128xbf16, #tpu.memory_space<vmem>>, vector<1x12x128xbf16>
    %10 = vector.shape_cast %9 : vector<1x12x128xbf16> to vector<12x128xbf16>
    %cst_12 = arith.constant dense<0.000000e+00> : vector<256x128xf32>
    %11 = tpu.matmul %8, %10, %cst_12 {dimension_numbers = #tpu.dot_dimension_numbers<[1], [0], [0], [1], [0, 0, 1, 1], [], []>} : vector<256x12xbf16>, vector<12x128xbf16>, vector<256x128xf32> -> vector<256x128xf32>
    %12 = arith.addf %5, %11 : vector<256x128xf32>
    %c0_13 = arith.constant 0 : index
    %c2 = arith.constant 2 : index
    %c0_14 = arith.constant 0 : index
    %c0_15 = arith.constant 0 : index
    %13 = vector.load %arg1[%c0_13, %c2, %c0_14, %c0_15] : memref<1x18x16x12xbf16, #tpu.memory_space<vmem>>, vector<1x16x16x12xbf16>
    %14 = vector.shape_cast %13 : vector<1x16x16x12xbf16> to vector<16x16x12xbf16>
    %15 = vector.shape_cast %14 : vector<16x16x12xbf16> to vector<256x12xbf16>
    %c2_16 = arith.constant 2 : index
    %c0_17 = arith.constant 0 : index
    %c0_18 = arith.constant 0 : index
    %16 = vector.load %arg2[%c2_16, %c0_17, %c0_18] : memref<3x12x128xbf16, #tpu.memory_space<vmem>>, vector<1x12x128xbf16>
    %17 = vector.shape_cast %16 : vector<1x12x128xbf16> to vector<12x128xbf16>
    %cst_19 = arith.constant dense<0.000000e+00> : vector<256x128xf32>
    %18 = tpu.matmul %15, %17, %cst_19 {dimension_numbers = #tpu.dot_dimension_numbers<[1], [0], [0], [1], [0, 0, 1, 1], [], []>} : vector<256x12xbf16>, vector<12x128xbf16>, vector<256x128xf32> -> vector<256x128xf32>
    %19 = arith.addf %12, %18 : vector<256x128xf32>
    %cst_20 = arith.constant dense<0.000000e+00> : vector<128xf32>
    %20 = vector.multi_reduction <add>, %19, %cst_20 [0] : vector<256x128xf32> to vector<128xf32>
    %21 = vector.shape_cast %20 : vector<128xf32> to vector<1x128xf32>
    %22 = arith.mulf %19, %19 : vector<256x128xf32>
    %cst_21 = arith.constant dense<0.000000e+00> : vector<128xf32>
    %23 = vector.multi_reduction <add>, %22, %cst_21 [0] : vector<256x128xf32> to vector<128xf32>
    %24 = vector.shape_cast %23 : vector<128xf32> to vector<1x128xf32>
    %25 = tpu.concatenate %21, %24 in 0 : vector<1x128xf32>, vector<1x128xf32> -> vector<2x128xf32>
    %c0_22 = arith.constant 0 : index
    %c0_23 = arith.constant 0 : index
    %c0_24 = arith.constant 0 : index
    %26 = vector.load %arg3[%c0_22, %c0_23, %c0_24] : memref<1x2x128xf32, #tpu.memory_space<vmem>>, vector<1x2x128xf32>
    %27 = vector.shape_cast %26 : vector<1x2x128xf32> to vector<2x128xf32>
    %28 = vector.shape_cast %25 : vector<2x128xf32> to vector<1x2x128xf32>
    tpu.vector_store %arg3[%c0_22, %c0_23, %c0_24], %28 {strides = array<i32>} : memref<1x2x128xf32, #tpu.memory_space<vmem>>, vector<1x2x128xf32>,
    return
  }
  func.func @transform_0(%arg0: i32) -> (i32, i32, i32, i32) {
    %c0_i32 = arith.constant 0 : i32
    %c0_i32_0 = arith.constant 0 : i32
    %c0_i32_1 = arith.constant 0 : i32
    %c0_i32_2 = arith.constant 0 : i32
    return %arg0, %c0_i32, %c0_i32_0, %c0_i32_1 : i32, i32, i32, i32
  }
  func.func @transform_1(%arg0: i32) -> (i32, i32, i32) {
    %c0_i32 = arith.constant 0 : i32
    %c0_i32_0 = arith.constant 0 : i32
    %c0_i32_1 = arith.constant 0 : i32
    %c0_i32_2 = arith.constant 0 : i32
    return %c0_i32, %c0_i32_0, %c0_i32_1 : i32, i32, i32
  }
  func.func @transform_2(%arg0: i32) -> (i32, i32, i32) {
    %c0_i32 = arith.constant 0 : i32
    %c0_i32_0 = arith.constant 0 : i32
    %c0_i32_1 = arith.constant 0 : i32
    return %arg0, %c0_i32, %c0_i32_0 : i32, i32, i32
  }
}

</mosaic_0001>

<bundles_post_ra>
// kernel: tpu_custom_call.1
= control target key start
LH: loop header
LB: loop body
LE: loop exit
PB: predicated region body
PF: predicated region fallthrough
CT: control target
= control target key end

     0   :  { %7 = vsyncpa [#allocation3], 0  ;;  %s2140_s0 = inlined_call_operand.vmem [shape: bf16[2,18,16,12], index: 0, kind: input, shape index: {}]   ;;  %s2141_s1 = inlined_call_operand.vmem [shape: bf16[3,12,128], index: 1, kind: input, shape index: {}]   ;;  %s2142_s2 = inlined_call_operand.hbm [shape: f32[2,2,128], index: 2, kind: output, shape index: {}]  }
   0x1   :  { %9 = vsyncpa [#allocation3 + $0x1], 0  ;;  %s1861_s9 = smov 0   ;;  %s1863_s10 = smov 0  }
   0x2   :  { %s1865_s11 = smov 0   ;;  %s1867_s12 = smov 0  }
   0x3 LB: > { %s1882_s13 = sadd.s32 4294967295, %s1843_s12   ;;  %s1356_s14 = sadd.s32 4294967294, %s1843_s12   ;;  %s1843_s12 = sphi %s1867_s12, %s2148_s12   ;;  %s1839_s11 = sphi %s1865_s11, %s2147_s11   ;;  %s1835_s10 = sphi %s1863_s10, %s2146_s10   ;;  %s1831_s9 = sphi %s1861_s9, %s2145_s9  }
   0x4   : > { %s1886_s15 = sadd.s32 1, %s1843_s12   ;;  %s69_s16 = sadd.s32 1, %s1839_s11 }
   0x5   : > { %s66_s17 = ssub.s32 %s1843_s12, %s1886_s15  ;;  %p79_p0 = scmp.ne.s32.totalorder %s1839_s11, %s1835_s10 }
   0x6   : > { %p67_p1 = scmp.eq.s32.totalorder %s66_s17, 0  ;;  %p80_p2 = scmp.eq.s32.totalorder %s1882_s13, 1 }
   0x7   : > { %p85_p3 = scmp.ne.s32.totalorder %s1835_s10, %s1831_s9  ;;  %p86_p4 = scmp.eq.s32.totalorder %s1356_s14, 1 }
   0x8   : > { %s1897_s18 = scalar_select %p67_p1, %s1839_s11, %s69_s16  }
   0x9   : > { %p1899_p5 = por %p80_p2, %p79_p0  ;;  %p1903_p6 = por %p86_p4, %p85_p3 }
   0xa   : > { %p1359_p7 = scmp.ge.s32.totalorder %s1843_s12, 1  ;;  %p115_p8 = scmp.lt.s32.totalorder %s1843_s12, 3 }
   0xc   : > { %p116_p9 = pnand %p1359_p7, %p115_p8 }
   0xd   : > { %p137_p10 = scmp.lt.s32.totalorder (!%p116_p9), %s1882_s13, 1  ;;  %s134_s4 = sand.u32 (!%p116_p9), 1, %s1835_s10  }
   0xe   : > { %119 = sbr.rel (%p116_p9) target bundleno = 352 (0x160), region = 28  ;;  %s1360_s5 = sshll.u32 (!%p116_p9), %s134_s4, 1 }
   0xf   : > { %s1530_s6 = sshll.u32 (!%p116_p9), %s1882_s13, 5  ;;  %s136_s7 = scalar_lea.vmem (!%p116_p9), [#allocation2], %s1360_s5 }
  0x10   : > { %s1297_s8 = sshll.u32 (!%p116_p9), %s136_s7, 4  ;;  %s2105_s17 = scalar_lea.hbm (!%p116_p9), %s2142_s2, %s1530_s6  ;;  %s1298_s8 = int_to_ptr.vmem [resolvable:$true] %s1297_s8 }
  0x11   : > { %s1284_s21 = scalar_lea.sflag (!%p116_p9), [#allocation3], %s134_s4  ;;  %s1783_s22 = scalar_lea.vmem (!%p116_p9), %s1298_s8, 32 }
  0x12   : > { %p1784_p11 = scmp.ne.s32.totalorder (!%p116_p9), %s1298_s8, %s1783_s22 }
  0x13   : > { %v1732_v0 = vld [vmem:[%s2141_s1 + $0x8] sm:$0x3f]   ;;  %vm347_vm0 = vcmask 1045504   ;;  %v1735_v2 = vld [vmem:[%s2141_s1] sm:$0x3f]   ;;  %s138_s25 = scalar_select %p137_p10, %s1882_s13, 1 }
  0x14   : > { %1689 = vmatprep.subr.msk.bf16.mxu1 %vm347_vm0, %v1732_v0  ;;  %1688 = vmatprep.subr.msk.bf16.mxu0 %vm347_vm0, %v1732_v0  ;;  %v349_v1 = vsel %vm347_vm0, %v1732_v0, 0  ;;  %v1738_v3 = vld [vmem:[%s2141_s1 + $0x10] sm:$0x3f]   ;;  %vm298_vm1 = vcmask 97280   ;;  %v646_v9 = vsel %vm347_vm0, %v1735_v2, 0  ;;  %vm1280_vm2 = vcmask 1040384   ;;  %p1785_p12 = pnand %p1784_p11, %p1899_p5 }
  0x15   : > { %1687 = vmatpush3.bf16.msra.mxu1 %v349_v1  ;;  %1585 = vmatpush3.bf16.msra.mxu0 %v349_v1  ;;  %s1692_s28 = smul.u32 144, %s138_s25  ;;  %v979_v7 = vsel %vm347_vm0, %v1738_v3, 0  ;;  %s1845_s13 = smov [#allocation2]  }
  0x16   : > { %1690 = vmatprep.subr.msk.bf16.mxu1 %vm347_vm0, %v1735_v2  ;;  %1691 = vmatprep.subr.msk.bf16.mxu0 %vm347_vm0, %v1738_v3  ;;  %p1786_p13 = pneg %p1785_p12  ;;  %s1787_s23 = sshll.u32 %s1845_s13, 4  ;;  %s1788_s23 = int_to_ptr.vmem [resolvable:$false] %s1787_s23 }
  0x17   : > { %s1928_s3 = scalar_lea.vmem %s2140_s0, %s1692_s28  ;;  %s1789_s24 = scalar_lea.vmem %s1788_s23, 64 }
  0x18   : > { %v1733_v4 = vld [vmem:[%s1928_s3 + $0x8] sm:$0xff]   ;;  %v1736_v6 = vld [vmem:[%s1928_s3 + $0x10] sm:$0xff]   ;;  %v1739_v10 = vld [vmem:[%s1928_s3 + $0x18] sm:$0xff]   ;;  %p1790_p0 = scmp.lt.s32.totalorder %s1298_s8, %s1788_s23  ;;  %p1791_p1 = scmp.lt.s32.totalorder %s1789_s24, %s1783_s22 }
  0x19   : > { %v1734_v5 = vld [vmem:[%s1928_s3 + $0x48] sm:$0xff]   ;;  %1586 = vmatprep.mubr.msk.bf16.mxu0 %vm298_vm1, %v1733_v4  ;;  %v1737_v8 = vld [vmem:[%s1928_s3 + $0x50] sm:$0xff]   ;;  %v1740_v11 = vld [vmem:[%s1928_s3 + $0x58] sm:$0xff]  }
  0x1a   : > { %1602 = vmatprep.mubr.msk.bf16.mxu1 %vm298_vm1, %v1734_v5  ;;  %1587 = vmatmul.mubr.msk.bf16.vlgmr.msra.gmra.mxu0 %vm298_vm1, %v1736_v6  ;;  %v1741_v12 = vld [vmem:[%s1928_s3 + $0x20] sm:$0xff]   ;;  %v1743_v14 = vld [vmem:[%s1928_s3 + $0x28] sm:$0xff]   ;;  %v1745_v16 = vld [vmem:[%s1928_s3 + $0x30] sm:$0xff]   ;;  %p1792_p2 = por %p1791_p1, %p1790_p0 }
  0x1b   : > { %1603 = vmatmul.mubr.msk.bf16.vlgmr.msra.gmra.mxu1 %vm298_vm1, %v1737_v8  ;;  %1653 = vmatpush3.bf16.msra.mxu0 %v979_v7  ;;  %v1742_v13 = vld [vmem:[%s1928_s3 + $0x60] sm:$0xff]   ;;  %v1744_v15 = vld [vmem:[%s1928_s3 + $0x68] sm:$0xff]   ;;  %v1746_v17 = vld [vmem:[%s1928_s3 + $0x70] sm:$0xff]  }
  0x1c   : > { %1619 = vmatpush3.bf16.msra.mxu1 %v646_v9  ;;  %1590 = vmatprep.mubr.msk.bf16.mxu0 %vm298_vm1, %v1739_v10  ;;  %v1747_v18 = vld [vmem:[%s1928_s3 + $0x38] sm:$0xff]   ;;  %v1749_v20 = vld [vmem:[%s1928_s3 + $0x40] sm:$0xff]   ;;  %v1752_v22 = vld [vmem:[%s1928_s3 + $0x10] sm:$0xff]   ;;  %p1793_p3 = pnand %p1792_p2, %p1786_p13 }
  0x1d   : > { %1606 = vmatprep.mubr.msk.bf16.mxu1 %vm298_vm1, %v1740_v11  ;;  %v1748_v19 = vld [vmem:[%s1928_s3 + $0x78] sm:$0xff]   ;;  %v1750_v21 = vld [vmem:[%s1928_s3 + $0x80] sm:$0xff]   ;;  %v1753_v24 = vld [vmem:[%s1928_s3 + $0x8] sm:$0xff]  }
  0x1e   : > { %v1751_v23 = vld [vmem:[%s1928_s3] sm:$0xff]   ;;  %v1754_v25 = vld [vmem:[%s1928_s3 + $0x18] sm:$0xff]   ;;  %v1755_v27 = vld [vmem:[%s1928_s3 + $0x10] sm:$0xff]  }
  0x1f   : > { %v1756_v26 = vld [vmem:[%s1928_s3 + $0x20] sm:$0xff]   ;;  %v1757_v28 = vld [vmem:[%s1928_s3 + $0x18] sm:$0xff]   ;;  %v1758_v29 = vld [vmem:[%s1928_s3 + $0x28] sm:$0xff]  }
  0x20   : > { %v1760_v30 = vld [vmem:[%s1928_s3 + $0x30] sm:$0xff]   ;;  %v1759_v31 = vld [vmem:[%s1928_s3 + $0x20] sm:$0xff]   ;;  %v1762_v32 = vld [vmem:[%s1928_s3 + $0x38] sm:$0xff]  }
  0x21   : > { %v1761_v33 = vld [vmem:[%s1928_s3 + $0x28] sm:$0xff]   ;;  %v1764_v34 = vld [vmem:[%s1928_s3 + $0x40] sm:$0xff]   ;;  %v1763_v35 = vld [vmem:[%s1928_s3 + $0x30] sm:$0xff]  }
  0x22   : > { %1591 = vmatmul.mubr.msk.bf16.gmra.mxu0 %vm298_vm1, %v1741_v12  ;;  %v1766_v36 = vld [vmem:[%s1928_s3 + $0x48] sm:$0xff]   ;;  %v1765_v37 = vld [vmem:[%s1928_s3 + $0x38] sm:$0xff]   ;;  %v1768_v38 = vld [vmem:[%s1928_s3 + $0x50] sm:$0xff]  }
  0x23   : > { %1607 = vmatmul.mubr.msk.bf16.gmra.mxu1 %vm298_vm1, %v1742_v13  ;;  %1594 = vmatprep.mubr.msk.bf16.mxu0 %vm298_vm1, %v1743_v14  ;;  %v1767_v39 = vld [vmem:[%s1928_s3 + $0x40] sm:$0xff]   ;;  %v1770_v40 = vld [vmem:[%s1928_s3 + $0x58] sm:$0xff]   ;;  %v1769_v41 = vld [vmem:[%s1928_s3 + $0x48] sm:$0xff]  }
  0x24   : > { %1610 = vmatprep.mubr.msk.bf16.mxu1 %vm298_vm1, %v1744_v15  ;;  %v1772_v42 = vld [vmem:[%s1928_s3 + $0x60] sm:$0xff]   ;;  %v1771_v43 = vld [vmem:[%s1928_s3 + $0x50] sm:$0xff]   ;;  %v1774_v44 = vld [vmem:[%s1928_s3 + $0x68] sm:$0xff]  }
  0x25   : > { %v1773_v45 = vld [vmem:[%s1928_s3 + $0x58] sm:$0xff]   ;;  %v1776_v46 = vld [vmem:[%s1928_s3 + $0x70] sm:$0xff]   ;;  %v1775_v47 = vld [vmem:[%s1928_s3 + $0x60] sm:$0xff]  }
  0x26   : > { %v1778_v48 = vld [vmem:[%s1928_s3 + $0x78] sm:$0xff]   ;;  %v1777_v49 = vld [vmem:[%s1928_s3 + $0x68] sm:$0xff]   ;;  %v1780_v50 = vld [vmem:[%s1928_s3 + $0x80] sm:$0xff]  }
  0x27   : > { %v1779_v51 = vld [vmem:[%s1928_s3 + $0x70] sm:$0xff]   ;;  %v1782_v52 = vld [vmem:[%s1928_s3 + $0x88] sm:$0xff]   ;;  %v1781_v53 = vld [vmem:[%s1928_s3 + $0x78] sm:$0xff]  }
  0x2a   : > { %1595 = vmatmul.mubr.msk.bf16.gmra.mxu0 %vm298_vm1, %v1745_v16 }
  0x2b   : > { %1611 = vmatmul.mubr.msk.bf16.gmra.mxu1 %vm298_vm1, %v1746_v17  ;;  %1598 = vmatprep.mubr.msk.bf16.mxu0 %vm298_vm1, %v1747_v18 }
  0x2c   : > { %1614 = vmatprep.mubr.msk.bf16.mxu1 %vm298_vm1, %v1748_v19 }
  0x32   : > { %1599 = vmatmul.mubr.msk.bf16.gmra.mxu0 %vm298_vm1, %v1749_v20 }
  0x33   : > { %1615 = vmatmul.mubr.msk.bf16.gmra.mxu1 %vm298_vm1, %v1750_v21  ;;  %1654 = vmatprep.mubr.msk.bf16.mxu0 %vm298_vm1, %v1752_v22 }
  0x34   : > { %1620 = vmatprep.mubr.msk.bf16.mxu1 %vm298_vm1, %v1751_v23 }
  0x3a   : > { %1655 = vmatmul.mubr.msk.bf16.vlgmr.msra.gmra.mxu0 %vm298_vm1, %v1754_v25 }
  0x3b   : > { %1621 = vmatmul.mubr.msk.bf16.vlgmr.msra.gmra.mxu1 %vm298_vm1, %v1753_v24  ;;  %1658 = vmatprep.mubr.msk.bf16.mxu0 %vm298_vm1, %v1756_v26 }
  0x3c   : > { %1624 = vmatprep.mubr.msk.bf16.mxu1 %vm298_vm1, %v1755_v27 }
  0x42   : > { %1659 = vmatmul.mubr.msk.bf16.gmra.mxu0 %vm298_vm1, %v1758_v29 }
  0x43   : > { %1625 = vmatmul.mubr.msk.bf16.gmra.mxu1 %vm298_vm1, %v1757_v28  ;;  %1662 = vmatprep.mubr.msk.bf16.mxu0 %vm298_vm1, %v1760_v30 }
  0x44   : > { %1628 = vmatprep.mubr.msk.bf16.mxu1 %vm298_vm1, %v1759_v31 }
  0x4a   : > { %1663 = vmatmul.mubr.msk.bf16.gmra.mxu0 %vm298_vm1, %v1762_v32 }
  0x4b   : > { %1629 = vmatmul.mubr.msk.bf16.gmra.mxu1 %vm298_vm1, %v1761_v33  ;;  %1666 = vmatprep.mubr.msk.bf16.mxu0 %vm298_vm1, %v1764_v34 }
  0x4c   : > { %1632 = vmatprep.mubr.msk.bf16.mxu1 %vm298_vm1, %v1763_v35 }
  0x52   : > { %1667 = vmatmul.mubr.msk.bf16.gmra.mxu0 %vm298_vm1, %v1766_v36 }
  0x53   : > { %1633 = vmatmul.mubr.msk.bf16.gmra.mxu1 %vm298_vm1, %v1765_v37  ;;  %1670 = vmatprep.mubr.msk.bf16.mxu0 %vm298_vm1, %v1768_v38 }
  0x54   : > { %1636 = vmatprep.mubr.msk.bf16.mxu1 %vm298_vm1, %v1767_v39 }
  0x5a   : > { %1671 = vmatmul.mubr.msk.bf16.gmra.mxu0 %vm298_vm1, %v1770_v40 }
  0x5b   : > { %1637 = vmatmul.mubr.msk.bf16.gmra.mxu1 %vm298_vm1, %v1769_v41  ;;  %1674 = vmatprep.mubr.msk.bf16.mxu0 %vm298_vm1, %v1772_v42 }
  0x5c   : > { %1640 = vmatprep.mubr.msk.bf16.mxu1 %vm298_vm1, %v1771_v43 }
  0x62   : > { %1675 = vmatmul.mubr.msk.bf16.gmra.mxu0 %vm298_vm1, %v1774_v44 }
  0x63   : > { %1641 = vmatmul.mubr.msk.bf16.gmra.mxu1 %vm298_vm1, %v1773_v45  ;;  %1678 = vmatprep.mubr.msk.bf16.mxu0 %vm298_vm1, %v1776_v46 }
  0x64   : > { %1644 = vmatprep.mubr.msk.bf16.mxu1 %vm298_vm1, %v1775_v47 }
  0x6a   : > { %1679 = vmatmul.mubr.msk.bf16.gmra.mxu0 %vm298_vm1, %v1778_v48 }
  0x6b   : > { %1645 = vmatmul.mubr.msk.bf16.gmra.mxu1 %vm298_vm1, %v1777_v49  ;;  %1682 = vmatprep.mubr.msk.bf16.mxu0 %vm298_vm1, %v1780_v50 }
  0x6c   : > { %1648 = vmatprep.mubr.msk.bf16.mxu1 %vm298_vm1, %v1779_v51 }
  0x72   : > { %1683 = vmatmul.mubr.msk.bf16.gmra.mxu0 %vm298_vm1, %v1782_v52 }
  0x73   : > { %1649 = vmatmul.mubr.msk.bf16.gmra.mxu1 %vm298_vm1, %v1781_v53 }
  0xda   : > { %v1588_v54 = vpop.f32.mrf.mxu0 }
  0xdb   : > { %v2028_v55 = vpop.f32.mrf.mxu1 }
  0xdc   : > { %v385_v56 = vpop.f32.mrf.mxu0 }
  0xdd   : > { %v2030_v57 = vpop.f32.mrf.mxu1 }
  0xde   : > { %v1589_v58 = vpop.f32.mrf.mxu0 }
  0xdf   : > { %v2032_v59 = vpop.f32.mrf.mxu1 }
  0xe0   : > { %v388_v60 = vpop.f32.mrf.mxu0 }
  0xe1   : > { %v2034_v61 = vpop.f32.mrf.mxu1 }
  0xe2   : > { %v1592_v62 = vpop.f32.mrf.mxu0 }
  0xe3   : > { %v2036_v63 = vpop.f32.mrf.mxu1 }
  0xe4   : > { %v401_v0 = vpop.f32.mrf.mxu0 }
  0xe5   : > { %v2038_v1 = vpop.f32.mrf.mxu1 }
  0xe6   : > { %v1593_v2 = vpop.f32.mrf.mxu0 }
  0xe7   : > { %v2040_v3 = vpop.f32.mrf.mxu1 }
  0xe8   : > { %v404_v4 = vpop.f32.mrf.mxu0 }
  0xe9   : > { %v2042_v5 = vpop.f32.mrf.mxu1 }
  0xea   : > { %v2044_v6 = vpop.f32.mrf.mxu0 }
  0xeb   : > { %v2046_v7 = vpop.f32.mrf.mxu1 }
  0xec   : > { %v2048_v8 = vpop.f32.mrf.mxu0 }
  0xed   : > { %v2050_v9 = vpop.f32.mrf.mxu1 }
  0xee   : > { %v2052_v10 = vpop.f32.mrf.mxu0 }
  0xef   : > { %v2054_v11 = vpop.f32.mrf.mxu1 }
  0xf0   : > { %v2056_v12 = vpop.f32.mrf.mxu0 }
  0xf1   : > { %v2058_v13 = vpop.f32.mrf.mxu1 }
  0xf2   : > { %v2060_v14 = vpop.f32.mrf.mxu0 }
  0xf3   : > { %v2062_v15 = vpop.f32.mrf.mxu1 }
  0xf4   : > { %v2064_v16 = vpop.f32.mrf.mxu0 }
  0xf5   : > { %v2066_v17 = vpop.f32.mrf.mxu1 }
  0xf6   : > { %v2068_v18 = vpop.f32.mrf.mxu0 }
  0xf7   : > { %v2070_v19 = vpop.f32.mrf.mxu1 }
  0xf8   : > { %v2072_v20 = vpop.f32.mrf.mxu0 }
  0xf9   : > { %v2074_v21 = vpop.f32.mrf.mxu1 }
  0xfa   : > { %v1656_v22 = vpop.f32.mrf.mxu0 }
  0xfb   : > { %v1622_v23 = vpop.f32.mrf.mxu1 }
  0xfc   : > { %v1015_v24 = vpop.f32.mrf.mxu0  ;;  %v691_v29 = vadd.f32 %v1622_v23, %v1588_v54 }
  0xfd   : > { %v682_v25 = vpop.f32.mrf.mxu1 }
  0xfe   : > { %v683_v26 = vadd.f32 %v682_v25, %v385_v56  ;;  %v1657_v27 = vpop.f32.mrf.mxu0  ;;  %v1144_v37 = vadd.f32 %v1656_v22, %v691_v29 }
  0xff   : > { %v1623_v28 = vpop.f32.mrf.mxu1 }
 0x100   : > { %v1018_v30 = vpop.f32.mrf.mxu0  ;;  %v694_v31 = vadd.f32 %v1623_v28, %v1589_v58  ;;  %v1142_v33 = vadd.f32 %v1015_v24, %v683_v26  ;;  %v1213_v49 = vmul.f32 %v1144_v37, %v1144_v37 }
 0x101   : > { %v685_v32 = vpop.f32.mrf.mxu1 }
 0x102   : > { %v686_v34 = vadd.f32 %v685_v32, %v388_v60  ;;  %v1660_v35 = vpop.f32.mrf.mxu0  ;;  %v1145_v40 = vadd.f32 %v1657_v27, %v694_v31  ;;  %v1211_v42 = vmul.f32 %v1142_v33, %v1142_v33 }
 0x103   : > { %v1626_v36 = vpop.f32.mrf.mxu1 }
 0x104   : > { %v1143_v38 = vadd.f32 %v1018_v30, %v686_v34  ;;  %v1031_v39 = vpop.f32.mrf.mxu0  ;;  %v707_v47 = vadd.f32 %v1626_v36, %v1592_v62  ;;  %v1214_v54 = vmul.f32 %v1145_v40, %v1145_v40 }
 0x105   : > { %v698_v41 = vpop.f32.mrf.mxu1 }
 0x106   : > { %v1174_v43 = vadd.f32 %v1143_v38, %v1142_v33  ;;  %v1212_v44 = vmul.f32 %v1143_v38, %v1143_v38  ;;  %v699_v45 = vadd.f32 %v698_v41, %v401_v0  ;;  %v1661_v46 = vpop.f32.mrf.mxu0  ;;  %v1148_v25 = vadd.f32 %v1660_v35, %v707_v47 }
 0x107   : > { %v1627_v48 = vpop.f32.mrf.mxu1 }
 0x108   : > { %v1175_v50 = vadd.f32 %v1174_v43, %v1144_v37  ;;  %v1243_v51 = vadd.f32 %v1212_v44, %v1211_v42  ;;  %v1146_v52 = vadd.f32 %v1031_v39, %v699_v45  ;;  %v1034_v53 = vpop.f32.mrf.mxu0  ;;  %v710_v22 = vadd.f32 %v1627_v48, %v1593_v2 }
 0x109   : > { %v701_v56 = vpop.f32.mrf.mxu1 }
 0x10a   : > { %v1244_v58 = vadd.f32 %v1243_v51, %v1213_v49  ;;  %v1176_v60 = vadd.f32 %v1175_v50, %v1145_v40  ;;  %v702_v23 = vadd.f32 %v701_v56, %v404_v4  ;;  %v1664_v24 = vpop.f32.mrf.mxu0  ;;  %v1215_v28 = vmul.f32 %v1146_v52, %v1146_v52 }
 0x10b   : > { %v1630_v26 = vpop.f32.mrf.mxu1  ;;  %v1149_v32 = vadd.f32 %v1661_v46, %v710_v22  ;;  %v1217_v4 = vmul.f32 %v1148_v25, %v1148_v25 }
 0x10c   : > { %v1177_v27 = vadd.f32 %v1176_v60, %v1146_v52  ;;  %v1245_v0 = vadd.f32 %v1244_v58, %v1214_v54  ;;  %v1147_v29 = vadd.f32 %v1034_v53, %v702_v23  ;;  %v1047_v62 = vpop.f32.mrf.mxu0  ;;  %v723_v37 = vadd.f32 %v1630_v26, %v2044_v6 }
 0x10d   : > { %v714_v30 = vpop.f32.mrf.mxu1  ;;  %v1218_v44 = vmul.f32 %v1149_v32, %v1149_v32 }
 0x10e   : > { %v1246_v31 = vadd.f32 %v1245_v0, %v1215_v28  ;;  %v1178_v33 = vadd.f32 %v1177_v27, %v1147_v29  ;;  %v1216_v34 = vmul.f32 %v1147_v29, %v1147_v29  ;;  %v1665_v36 = vpop.f32.mrf.mxu0  ;;  %v715_v38 = vadd.f32 %v714_v30, %v2048_v8 }
 0x10f   : > { %v1631_v2 = vpop.f32.mrf.mxu1  ;;  %v1152_v49 = vadd.f32 %v1664_v24, %v723_v37 }
 0x110   : > { %v1179_v39 = vadd.f32 %v1178_v33, %v1148_v25  ;;  %v1247_v35 = vadd.f32 %v1246_v31, %v1216_v34  ;;  %v1050_v40 = vpop.f32.mrf.mxu0  ;;  %v1150_v41 = vadd.f32 %v1047_v62, %v715_v38  ;;  %v726_v42 = vadd.f32 %v1631_v2, %v2052_v10 }
 0x111   : > { %v717_v43 = vpop.f32.mrf.mxu1  ;;  %v1221_v26 = vmul.f32 %v1152_v49, %v1152_v49 }
 0x112   : > { %v1248_v45 = vadd.f32 %v1247_v35, %v1217_v4  ;;  %v1180_v47 = vadd.f32 %v1179_v39, %v1149_v32  ;;  %v718_v46 = vadd.f32 %v717_v43, %v2056_v12  ;;  %v1668_v48 = vpop.f32.mrf.mxu0  ;;  %v1219_v51 = vmul.f32 %v1150_v41, %v1150_v41 }
 0x113   : > { %v1634_v50 = vpop.f32.mrf.mxu1  ;;  %v1153_v54 = vadd.f32 %v1665_v36, %v726_v42 }
 0x114   : > { %v1181_v6 = vadd.f32 %v1180_v47, %v1150_v41  ;;  %v1249_v8 = vadd.f32 %v1248_v45, %v1218_v44  ;;  %v1151_v52 = vadd.f32 %v1050_v40, %v718_v46  ;;  %v1063_v53 = vpop.f32.mrf.mxu0  ;;  %v739_v0 = vadd.f32 %v1634_v50, %v2060_v14 }
 0x115   : > { %v730_v56 = vpop.f32.mrf.mxu1  ;;  %v1222_v62 = vmul.f32 %v1153_v54, %v1153_v54 }
 0x116   : > { %v1250_v58 = vadd.f32 %v1249_v8, %v1219_v51  ;;  %v1182_v60 = vadd.f32 %v1181_v6, %v1151_v52  ;;  %v1220_v22 = vmul.f32 %v1151_v52, %v1151_v52  ;;  %v731_v10 = vadd.f32 %v730_v56, %v2064_v16  ;;  %v1669_v23 = vpop.f32.mrf.mxu0 }
 0x117   : > { %v1635_v25 = vpop.f32.mrf.mxu1  ;;  %v1156_v4 = vadd.f32 %v1668_v48, %v739_v0 }
 0x118   : > { %v1183_v27 = vadd.f32 %v1182_v60, %v1152_v49  ;;  %v1251_v12 = vadd.f32 %v1250_v58, %v1220_v22  ;;  %v1154_v28 = vadd.f32 %v1063_v53, %v731_v10  ;;  %v1066_v24 = vpop.f32.mrf.mxu0  ;;  %v742_v33 = vadd.f32 %v1635_v25, %v2068_v18 }
 0x119   : > { %v733_v29 = vpop.f32.mrf.mxu1 }
 0x11a   : > { %v1252_v30 = vadd.f32 %v1251_v12, %v1221_v26  ;;  %v1184_v31 = vadd.f32 %v1183_v27, %v1153_v54  ;;  %v1672_v32 = vpop.f32.mrf.mxu0  ;;  %v734_v34 = vadd.f32 %v733_v29, %v2072_v20  ;;  %v1223_v37 = vmul.f32 %v1154_v28, %v1154_v28 }
 0x11b   : > { %v1638_v36 = vpop.f32.mrf.mxu1  ;;  %v1157_v42 = vadd.f32 %v1669_v23, %v742_v33  ;;  %v1225_v20 = vmul.f32 %v1156_v4, %v1156_v4 }
 0x11c   : > { %v1185_v16 = vadd.f32 %v1184_v31, %v1154_v28  ;;  %v1253_v38 = vadd.f32 %v1252_v30, %v1222_v62  ;;  %v1079_v2 = vpop.f32.mrf.mxu0  ;;  %v1155_v39 = vadd.f32 %v1066_v24, %v734_v34  ;;  %v755_v18 = vadd.f32 %v1638_v36, %v2028_v55 }
 0x11d   : > { %v746_v35 = vpop.f32.mrf.mxu1  ;;  %v1226_v8 = vmul.f32 %v1157_v42, %v1157_v42 }
 0x11e   : > { %v1254_v40 = vadd.f32 %v1253_v38, %v1223_v37  ;;  %v747_v14 = vadd.f32 %v746_v35, %v2030_v57  ;;  %v1673_v41 = vpop.f32.mrf.mxu0  ;;  %v1186_v43 = vadd.f32 %v1185_v16, %v1155_v39  ;;  %v1224_v44 = vmul.f32 %v1155_v39, %v1155_v39 }
 0x11f   : > { %v1639_v45 = vpop.f32.mrf.mxu1  ;;  %v1160_v56 = vadd.f32 %v1672_v32, %v755_v18 }
 0x120   : > { %v1082_v47 = vpop.f32.mrf.mxu0  ;;  %v1187_v46 = vadd.f32 %v1186_v43, %v1156_v4  ;;  %v1255_v49 = vadd.f32 %v1254_v40, %v1224_v44  ;;  %v1158_v50 = vadd.f32 %v1079_v2, %v747_v14  ;;  %v758_v57 = vadd.f32 %v1639_v45, %v2032_v59 }
 0x121   : > { %v749_v6 = vpop.f32.mrf.mxu1  ;;  %v1229_v0 = vmul.f32 %v1160_v56, %v1160_v56 }
 0x122   : > { %v750_v48 = vadd.f32 %v749_v6, %v2034_v61  ;;  %v1676_v51 = vpop.f32.mrf.mxu0  ;;  %v1256_v52 = vadd.f32 %v1255_v49, %v1225_v20  ;;  %v1188_v53 = vadd.f32 %v1187_v46, %v1157_v42  ;;  %v1227_v55 = vmul.f32 %v1158_v50, %v1158_v50 }
 0x123   : > { %v1642_v54 = vpop.f32.mrf.mxu1  ;;  %v1161_v61 = vadd.f32 %v1673_v41, %v758_v57 }
 0x124   : > { %v1159_v58 = vadd.f32 %v1082_v47, %v750_v48  ;;  %v1095_v60 = vpop.f32.mrf.mxu0  ;;  %v1189_v22 = vadd.f32 %v1188_v53, %v1158_v50  ;;  %v1257_v10 = vadd.f32 %v1256_v52, %v1226_v8  ;;  %v771_v30 = vadd.f32 %v1642_v54, %v2036_v63 }
 0x125   : > { %v762_v23 = vpop.f32.mrf.mxu1  ;;  %v1230_v36 = vmul.f32 %v1161_v61, %v1161_v61 }
 0x126   : > { %v1228_v25 = vmul.f32 %v1159_v58, %v1159_v58  ;;  %v763_v26 = vadd.f32 %v762_v23, %v2038_v1  ;;  %v1677_v27 = vpop.f32.mrf.mxu0  ;;  %v1258_v12 = vadd.f32 %v1257_v10, %v1227_v55  ;;  %v1190_v28 = vadd.f32 %v1189_v22, %v1159_v58 }
 0x127   : > { %v1643_v24 = vpop.f32.mrf.mxu1  ;;  %v1164_v39 = vadd.f32 %v1676_v51, %v771_v30 }
 0x128   : > { %v1098_v29 = vpop.f32.mrf.mxu0  ;;  %v1191_v62 = vadd.f32 %v1190_v28, %v1160_v56  ;;  %v1259_v59 = vadd.f32 %v1258_v12, %v1228_v25  ;;  %v1162_v31 = vadd.f32 %v1095_v60, %v763_v26  ;;  %v774_v1 = vadd.f32 %v1643_v24, %v2040_v3 }
 0x129   : > { %v765_v32 = vpop.f32.mrf.mxu1  ;;  %v1233_v3 = vmul.f32 %v1164_v39, %v1164_v39 }
 0x12a   : > { %v766_v33 = vadd.f32 %v765_v32, %v2042_v5  ;;  %v1680_v34 = vpop.f32.mrf.mxu0  ;;  %v1260_v16 = vadd.f32 %v1259_v59, %v1229_v0  ;;  %v1192_v37 = vadd.f32 %v1191_v62, %v1161_v61  ;;  %v1231_v40 = vmul.f32 %v1162_v31, %v1162_v31 }
 0x12b   : > { %v1646_v38 = vpop.f32.mrf.mxu1  ;;  %v1165_v5 = vadd.f32 %v1677_v27, %v774_v1 }
 0x12c   : > { %v1163_v2 = vadd.f32 %v1098_v29, %v766_v33  ;;  %v1111_v4 = vpop.f32.mrf.mxu0  ;;  %v1193_v35 = vadd.f32 %v1192_v37, %v1162_v31  ;;  %v1261_v14 = vadd.f32 %v1260_v16, %v1230_v36  ;;  %v787_v47 = vadd.f32 %v1646_v38, %v2046_v7 }
 0x12d   : > { %v778_v41 = vpop.f32.mrf.mxu1  ;;  %v1234_v8 = vmul.f32 %v1165_v5, %v1165_v5 }
 0x12e   : > { %v1232_v42 = vmul.f32 %v1163_v2, %v1163_v2  ;;  %v779_v63 = vadd.f32 %v778_v41, %v2050_v9  ;;  %v1681_v43 = vpop.f32.mrf.mxu0  ;;  %v1262_v44 = vadd.f32 %v1261_v14, %v1231_v40  ;;  %v1194_v45 = vadd.f32 %v1193_v35, %v1163_v2 }
 0x12f   : > { %v1647_v18 = vpop.f32.mrf.mxu1  ;;  %v1168_v54 = vadd.f32 %v1680_v34, %v787_v47 }
 0x130   : > { %v1114_v20 = vpop.f32.mrf.mxu0  ;;  %v1195_v46 = vadd.f32 %v1194_v45, %v1164_v39  ;;  %v1263_v49 = vadd.f32 %v1262_v44, %v1232_v42  ;;  %v1166_v50 = vadd.f32 %v1111_v4, %v779_v63  ;;  %v790_v9 = vadd.f32 %v1647_v18, %v2054_v11 }
 0x131   : > { %v781_v6 = vpop.f32.mrf.mxu1  ;;  %v1237_v61 = vmul.f32 %v1168_v54, %v1168_v54 }
 0x132   : > { %v782_v48 = vadd.f32 %v781_v6, %v2058_v13  ;;  %v1684_v51 = vpop.f32.mrf.mxu0  ;;  %v1264_v52 = vadd.f32 %v1263_v49, %v1233_v3  ;;  %v1196_v53 = vadd.f32 %v1195_v46, %v1165_v5  ;;  %v1235_v7 = vmul.f32 %v1166_v50, %v1166_v50 }
 0x133   : > { %v1650_v57 = vpop.f32.mrf.mxu1  ;;  %v1169_v26 = vadd.f32 %v1681_v43, %v790_v9 }
 0x134   : > { %v1167_v56 = vadd.f32 %v1114_v20, %v782_v48  ;;  %v1127_v58 = vpop.f32.mrf.mxu0  ;;  %v1197_v60 = vadd.f32 %v1196_v53, %v1166_v50  ;;  %v1265_v22 = vadd.f32 %v1264_v52, %v1234_v8  ;;  %v803_v11 = vadd.f32 %v1650_v57, %v2062_v15 }
 0x135   : > { %v794_v55 = vpop.f32.mrf.mxu1  ;;  %v1238_v59 = vmul.f32 %v1169_v26, %v1169_v26 }
 0x136   : > { %v1236_v10 = vmul.f32 %v1167_v56, %v1167_v56  ;;  %v795_v23 = vadd.f32 %v794_v55, %v2066_v17  ;;  %v1266_v25 = vadd.f32 %v1265_v22, %v1235_v7  ;;  %v1198_v13 = vadd.f32 %v1197_v60, %v1167_v56  ;;  %v1685_v12 = vpop.f32.mrf.mxu0 }
 0x137   : > { %v1651_v27 = vpop.f32.mrf.mxu1  ;;  %v1172_v34 = vadd.f32 %v1684_v51, %v803_v11 }
 0x138   : > { %v1199_v28 = vadd.f32 %v1198_v13, %v1168_v54  ;;  %v1267_v24 = vadd.f32 %v1266_v25, %v1236_v10  ;;  %v1170_v0 = vadd.f32 %v1127_v58, %v795_v23  ;;  %v806_v32 = vadd.f32 %v1651_v27, %v2070_v19  ;;  %v1130_v17 = vpop.f32.mrf.mxu0 }
 0x139   : > { %v797_v29 = vpop.f32.mrf.mxu1  ;;  %v1241_v4 = vmul.f32 %v1172_v34, %v1172_v34 }
 0x13a   : > { %v798_v62 = vadd.f32 %v797_v29, %v2074_v21  ;;  %v1268_v30 = vadd.f32 %v1267_v24, %v1237_v61  ;;  %v1200_v31 = vadd.f32 %v1199_v28, %v1169_v26  ;;  %v1239_v16 = vmul.f32 %v1170_v0, %v1170_v0 }
 0x13b   : > { %v1173_v2 = vadd.f32 %v1685_v12, %v806_v32 }
 0x13c   : > { %v1171_v33 = vadd.f32 %v1130_v17, %v798_v62  ;;  %v1201_v36 = vadd.f32 %v1200_v31, %v1170_v0  ;;  %v1269_v37 = vadd.f32 %v1268_v30, %v1238_v59 }
 0x13d   : > { %v1242_v21 = vmul.f32 %v1173_v2, %v1173_v2 }
 0x13e   : > { %v1240_v1 = vmul.f32 %v1171_v33, %v1171_v33  ;;  %v1270_v38 = vadd.f32 %v1269_v37, %v1239_v16  ;;  %v1202_v15 = vadd.f32 %v1201_v36, %v1171_v33 }
 0x140   : > { %v1203_v39 = vadd.f32 %v1202_v15, %v1172_v34  ;;  %v1271_v35 = vadd.f32 %v1270_v38, %v1240_v1 }
 0x142   : > { %v1204_v40 = vadd.f32 %v1203_v39, %v1173_v2  ;;  %v1272_v14 = vadd.f32 %v1271_v35, %v1241_v4 }
 0x144   : > { %v1205_v41 = vrot.slane %v1204_v40, 4  ;;  %v1273_v19 = vadd.f32 %v1272_v14, %v1242_v21 }
 0x146   : > { %v1206_v42 = vadd.f32 %v1205_v41, %v1204_v40  ;;  %v1274_v63 = vrot.slane %v1273_v19, 4 }
 0x148   : > { %v1207_v43 = vrot.slane %v1206_v42, 2  ;;  %v1275_v44 = vadd.f32 %v1274_v63, %v1273_v19 }
 0x14a   : > { %v1208_v5 = vadd.f32 %v1207_v43, %v1206_v42  ;;  %v1276_v45 = vrot.slane %v1275_v44, 2 }
 0x14c   : > { %v1209_v18 = vrot.slane %v1208_v5, 1  ;;  %v1277_v47 = vadd.f32 %v1276_v45, %v1275_v44 }
 0x14e   : > { %v1278_v20 = vrot.slane %v1277_v47, 1  ;;  %v1210_v3 = vadd.f32 %v1209_v18, %v1208_v5 }
 0x150   : > { %v1279_v46 = vadd.f32 %v1278_v20, %v1277_v47 }
 0x152   : > { %v1281_v49 = vsel %vm1280_vm2, %v1210_v3, %v1279_v46 }
 0x153   : > { %1282 = vst [vmem:[%s136_s7] sm:$0x3] %v1281_v49 }
 0x154   : > { %1796 = shalt.err (!%p1793_p3)
}
 0x155   : > { %s1797_s25 = scalar_lea.hbm %s2105_s17, 32  ;;  %s1801_s28 = scalar_lea.hbm %s2142_s2, 64 }
 0x156   : > { %p1798_p4 = scmp.ne.s32.totalorder %s2105_s17, %s1797_s25  ;;  %p1802_p9 = scmp.lt.s32.totalorder %s2105_s17, %s2142_s2 }
 0x157   : > { %p1803_p10 = scmp.lt.s32.totalorder %s1801_s28, %s1797_s25 }
 0x158   : > { %p1799_p7 = pnand %p1798_p4, %p1899_p5 }
 0x159   : > { %p1804_p11 = por %p1803_p10, %p1802_p9 }
 0x15a   : > { %p1800_p8 = pneg %p1799_p7 }
 0x15c   : > { %p1805_p12 = pnand %p1804_p11, %p1800_p8 }
 0x15e   : > { %1808 = shalt.err (!%p1805_p12)
}
 0x15f   : > { %1693 = dma.vmem_to_hbm [thread:$0]  (%p1899_p5), %s1298_s8, 32, %s2105_s17, %s1284_s21  }
 0x160 PF: > { %p1699_p13 = scmp.ge.s32.totalorder %s1843_s12, 2  ;;  %s1309_s3 = sand.u32 1, %s1831_s9  }
 0x161   : > { %s1310_s4 = scalar_lea.sflag [#allocation3], %s1309_s3 }
 0x162   : > { %p1696_p0 = pnand %p1699_p13, %p1903_p6 }
 0x164   : > { %p1697_p1 = pneg %p1696_p0 }
 0x166   : > { %1826 = dma.done.wait (%p1697_p1), %s1310_s4, 32  }
 0x167   : > { %1828 = vsyncadd (%p1697_p1), %s1310_s4, 4294967264  ;;  %p12_p2 = scmp.ge.s32.totalorder %s1886_s15, 4   ;;  %s2145_s9 = smov %s1835_s10 }
 0x168   : > { %s2146_s10 = smov %s1839_s11  ;;  %s2147_s11 = smov %s1897_s18 }
 0x169   : > { %s2148_s12 = smov %s1886_s15  ;;  %14 = sbr.rel (!%p12_p2) target bundleno = 3 (0x3), region = 67 }
 0x16e   :  { %1315 = vsyncpa [#allocation3], 1 }
 0x16f   :  { %1317 = vsyncpa [#allocation3 + $0x1], 1 }

</bundles_post_ra>
